<compile_context>
chip_gen: v5e
topology: v5e:2x2
jax: 0.10.0
libtpu: 0.0.40
codegen_flags: <defaults>
</compile_context>

<pallas_src>
import math

import jax
import jax.numpy as jnp
from jax.experimental import pallas as pl
from jax.experimental.pallas import tpu as pltpu


def _round_up(x, m):
    return ((x + m - 1) // m) * m


def _cdiv(a, b):
    return (a + b - 1) // b


def _vmem_capacity_bytes():
    """Real per-TensorCore VMEM (64 MiB on v7x, 128 MiB on v5e/v6e)."""
    try:
        info = pltpu.get_tpu_info()
        cap = int(getattr(info, "vmem_capacity_bytes", 0))
        if cap > 0:
            return cap
    except Exception:
        pass
    return 128 << 20


def ffn_kernel(x_ref, w1_ref, b1_ref, w2_ref, b2_ref, o_ref, acc_ref):
    j = pl.program_id(1)

    @pl.when(j == 0)
    def _():
        acc_ref[...] = jnp.zeros_like(acc_ref)

    # linear1 slice: (row_tile, d_model_p) @ (d_model_p, ff_tile), f32 accumulate on MXU.
    h = jnp.dot(x_ref[...], w1_ref[...], preferred_element_type=jnp.float32)
    h = h + b1_ref[...]  # bias kept in f32

    # Exact (erf-based) GELU in f32 — matches F.gelu default semantics.
    g = 0.5 * h * (1.0 + jax.lax.erf(h * (1.0 / math.sqrt(2.0))))

    # dropout == identity (eval mode).
    # TODO(synk): training-mode dropout mask not implemented.

    # linear2 partial sum over this d_ff slice, accumulated in f32 VMEM scratch.
    acc_ref[...] += jnp.dot(
        g.astype(w2_ref.dtype), w2_ref[...], preferred_element_type=jnp.float32
    )

    @pl.when(j == pl.num_programs(1) - 1)
    def _():
        o_ref[...] = (acc_ref[...] + b2_ref[...]).astype(o_ref.dtype)


def feed_forward(x, w1, b1, w2, b2, *, row_tile=512, ff_tile=None, cast_to_bf16=True):
    """x: (batch, seq, d_model); w1: (d_model, d_ff); w2: (d_ff, d_model).

    Weights are stored transposed relative to torch.nn.Linear so the kernel
    computes x @ W directly.
    """
    batch, seq, d_model = x.shape
    d_ff = w1.shape[1]
    n = batch * seq

    out_dtype = x.dtype
    compute_dtype = (
        jnp.bfloat16 if (cast_to_bf16 and x.dtype == jnp.float32) else x.dtype
    )
    xb = jnp.dtype(compute_dtype).itemsize
    wb = xb
    ob = jnp.dtype(out_dtype).itemsize

    # 256-aligned feature dims: full MXU waves on v6e/v7x, lane-dense stores.
    d_model_p = _round_up(d_model, 256)
    d_ff_p = _round_up(d_ff, 256)

    vmem_cap = _vmem_capacity_bytes()
    vmem_budget = int(0.80 * vmem_cap)

    # ---------------- tile selection ----------------
    ra = 8 if xb == 4 else 16  # sublane alignment for the compute dtype
    n_al = _round_up(max(n, 1), ra)
    row_tile = _round_up(min(row_tile, n_al), ra)
    # Megacore (v7x): keep >=2 row tiles so both TensorCores get work.
    if n_al // row_tile < 2 and n_al >= 2 * ra:
        row_tile = _round_up(_cdiv(n_al, 2), ra)

    def _act_bytes(rt):
        # x (double buffered) + out (double buffered) + f32 accumulator scratch.
        return rt * d_model_p * (2 * xb + 2 * ob + 4)

    bias_vmem = 2 * (d_ff_p + d_model_p) * 4
    min_slab = 2 * 2 * d_model_p * 256 * wb  # double-buffered 256-wide W1+W2 slabs
    while _act_bytes(row_tile) + bias_vmem + min_slab > vmem_budget and row_tile > 64:
        row_tile = max(64, _round_up(row_tile // 2, ra))
    n_p = _round_up(n_al, row_tile)

    w_full = 2 * d_model_p * d_ff_p * wb  # W1 + W2 fully resident, single copy
    act = _act_bytes(row_tile)
    if ff_tile is None and act + bias_vmem + 2 * w_full <= vmem_budget:
        resident, single_buf = True, False
        ff_t = d_ff_p
    elif ff_tile is None and act + bias_vmem + w_full <= vmem_budget:
        # Resident weights with a single VMEM buffer (no double buffering needed:
        # the block index never changes, so the DMA happens exactly once).
        resident, single_buf = True, True
        ff_t = d_ff_p
    else:
        # Streaming fallback: pick the largest 256-multiple ff_tile that fits.
        # TODO(synk): for extreme d_model on v7x, also tile the output d_model
        # columns (third grid axis) instead of only shrinking ff_tile/row_tile.
        resident, single_buf = False, False
        remaining = vmem_budget - act - bias_vmem
        per_col = 2 * 2 * d_model_p * wb  # two slabs, double buffered, per ff column
        ff_t = max(256, (max(remaining, 0) // per_col) // 256 * 256)
        if ff_tile is not None:
            ff_t = max(256, _round_up(min(ff_tile, ff_t), 256))
        ff_t = min(ff_t, d_ff_p)

    d_ff_grid = _cdiv(d_ff_p, ff_t)
    d_ff_pad = d_ff_grid * ff_t
    num_row_tiles = n_p // row_tile
    grid = (num_row_tiles, d_ff_grid)

    # ---------------- padding (skipped when already aligned) ----------------
    def _pad2(a, rows, cols, dtype):
        a = a.astype(dtype)
        pr, pc = rows - a.shape[0], cols - a.shape[1]
        if pr or pc:
            a = jnp.pad(a, ((0, pr), (0, pc)))
        return a

    x2 = x.reshape(n, d_model).astype(compute_dtype)
    if (n_p - n) or (d_model_p - d_model):
        x2 = jnp.pad(x2, ((0, n_p - n), (0, d_model_p - d_model)))
    w1_p = _pad2(w1, d_model_p, d_ff_pad, compute_dtype)
    w2_p = _pad2(w2, d_ff_pad, d_model_p, compute_dtype)
    b1_p = _pad2(b1.reshape(1, d_ff), 1, d_ff_pad, jnp.float32)
    b2_p = _pad2(b2.reshape(1, d_model), 1, d_model_p, jnp.float32)

    # ---------------- cost estimate (actual HBM traffic) ----------------
    w_hbm = w1_p.size * wb + w2_p.size * wb + (b1_p.size + b2_p.size) * 4
    weight_traffic = w_hbm if resident else num_row_tiles * w_hbm
    bytes_accessed = x2.size * xb + n_p * d_model_p * ob + weight_traffic
    cost = pl.CostEstimate(
        flops=int(4 * n_p * d_model_p * d_ff_pad),
        transcendentals=int(n_p * d_ff_pad),
        bytes_accessed=int(bytes_accessed),
    )

    # ---------------- VMEM limit (capped at real device VMEM) ----------------
    if resident:
        w_vmem = (1 if single_buf else 2) * 2 * d_model_p * d_ff_pad * wb
    else:
        w_vmem = 2 * 2 * d_model_p * ff_t * wb
    vmem_est = act + bias_vmem + w_vmem
    vmem_limit = max(32 << 20, int(1.15 * vmem_est) + (2 << 20))
    vmem_limit = min(vmem_limit, int(0.9 * vmem_cap))

    # ---------------- block specs ----------------
    w_kwargs = dict(pipeline_mode=pl.Buffered(1)) if single_buf else {}
    in_specs = [
        pl.BlockSpec((row_tile, d_model_p), lambda i, j: (i, 0)),            # x rows (resident over j)
        pl.BlockSpec((d_model_p, ff_t), lambda i, j: (0, j), **w_kwargs),    # W1[:, j] slab
        pl.BlockSpec((1, ff_t), lambda i, j: (0, j)),                        # b1[j]
        pl.BlockSpec((ff_t, d_model_p), lambda i, j: (j, 0), **w_kwargs),    # W2[j, :] slab
        pl.BlockSpec((1, d_model_p), lambda i, j: (0, 0)),                   # b2
    ]

    out = pl.pallas_call(
        ffn_kernel,
        out_shape=jax.ShapeDtypeStruct((n_p, d_model_p), out_dtype),
        grid_spec=pltpu.PrefetchScalarGridSpec(
            num_scalar_prefetch=0,
            grid=grid,
            in_specs=in_specs,
            out_specs=pl.BlockSpec((row_tile, d_model_p), lambda i, j: (i, 0)),
            scratch_shapes=[pltpu.VMEM((row_tile, d_model_p), jnp.float32)],
        ),
        compiler_params=pltpu.CompilerParams(
            dimension_semantics=("parallel", "arbitrary"),
            vmem_limit_bytes=int(vmem_limit),
        ),
        cost_estimate=cost,
    )(x2, w1_p, b1_p, w2_p, b2_p)

    return out[:n, :d_model].reshape(batch, seq, d_model)


def _init_linear(key, in_features, out_features, dtype=jnp.float32):
    # matches nn.Linear default init: U(-1/sqrt(fan_in), 1/sqrt(fan_in));
    # stored transposed relative to PyTorch: (in, out) so kernel does x @ W.
    kw, kb = jax.random.split(key)
    bound = 1.0 / math.sqrt(in_features)
    w = jax.random.uniform(kw, (in_features, out_features), dtype, -bound, bound)
    b = jax.random.uniform(kb, (out_features,), dtype, -bound, bound)
    return w, b


def _reference(x, w1, b1, w2, b2):
    h = jnp.dot(x, w1) + b1
    g = 0.5 * h * (1.0 + jax.lax.erf(h / jnp.sqrt(2.0)))
    return jnp.dot(g, w2) + b2


if __name__ == "__main__":
    key = jax.random.PRNGKey(0)
    k_x, k_l1, k_l2 = jax.random.split(key, 3)

    batch, seq, d_model, d_ff = 2, 8, 32, 64
    x = jax.random.normal(k_x, (batch, seq, d_model), jnp.float32)
    w1, b1 = _init_linear(k_l1, d_model, d_ff)
    w2, b2 = _init_linear(k_l2, d_ff, d_model)

    ref = _reference(x, w1, b1, w2, b2)

    # 1) pure-f32 path: tight agreement with the f32 reference.
    out_f32 = jax.block_until_ready(
        feed_forward(x, w1, b1, w2, b2, cast_to_bf16=False)
    )
    assert out_f32.shape == (batch, seq, d_model)
    assert jnp.allclose(out_f32, ref, atol=2e-5, rtol=2e-5), "f32 path mismatch"

    # 2) default fast path: f32 inputs cast to bf16 for the MXU, f32 accumulation.
    out_fast = jax.block_until_ready(feed_forward(x, w1, b1, w2, b2))
    assert out_fast.shape == (batch, seq, d_model)
    assert jnp.allclose(out_fast, ref, atol=3e-2, rtol=3e-2), "bf16 path mismatch"

    print("KERNEL_OK")
</pallas_src>

<mosaic_0001>
module attributes {stable_mosaic.version = 11 : i64} {
  func.func @ffn_kernel(%arg0: i32, %arg1: i32, %arg2: memref<8x256xf32, #tpu.memory_space<vmem>>, %arg3: memref<256x256xf32, #tpu.memory_space<vmem>>, %arg4: memref<1x256xf32, #tpu.memory_space<vmem>>, %arg5: memref<256x256xf32, #tpu.memory_space<vmem>>, %arg6: memref<1x256xf32, #tpu.memory_space<vmem>>, %arg7: memref<8x256xf32, #tpu.memory_space<vmem>>, %arg8: memref<8x256xf32, #tpu.memory_space<vmem>>) attributes {dimension_semantics = [#tpu.dimension_semantics<parallel>, #tpu.dimension_semantics<arbitrary>], iteration_bounds = array<i64: 2, 1>, scalar_prefetch = 0 : i64, scratch_operands = 1 : i64, tpu.core_type = #tpu.core_type<tc>, window_params = [{transform_indices = @transform_0, window_bounds = array<i64: 8, 256>}, {transform_indices = @transform_1, window_bounds = array<i64: 256, 256>}, {transform_indices = @transform_2, window_bounds = array<i64: 1, 256>}, {transform_indices = @transform_3, window_bounds = array<i64: 256, 256>}, {pipeline_mode = #tpu.pipeline_mode<synchronous>, transform_indices = @transform_4, window_bounds = array<i64: 1, 256>}, {transform_indices = @transform_5, window_bounds = array<i64: 8, 256>}]} {
    %c0_i32 = arith.constant 0 : i32
    %0 = arith.cmpi eq, %arg1, %c0_i32 : i32
    %1 = arith.extui %0 : i1 to i32
    %c0_i32_0 = arith.constant 0 : i32
    %2 = arith.cmpi ne, %1, %c0_i32_0 : i32
    scf.if %2 {
      %cst_18 = arith.constant 0.000000e+00 : f32
      %25 = vector.broadcast %cst_18 : f32 to vector<8x256xf32>
      %c0_19 = arith.constant 0 : index
      %c0_20 = arith.constant 0 : index
      %26 = vector.load %arg8[%c0_19, %c0_20] : memref<8x256xf32, #tpu.memory_space<vmem>>, vector<8x256xf32>
      tpu.vector_store %arg8[%c0_19, %c0_20], %25 {strides = array<i32>} : memref<8x256xf32, #tpu.memory_space<vmem>>, vector<8x256xf32>,
    } else {
    }
    %c0 = arith.constant 0 : index
    %c0_1 = arith.constant 0 : index
    %3 = vector.load %arg2[%c0, %c0_1] : memref<8x256xf32, #tpu.memory_space<vmem>>, vector<8x256xf32>
    %c0_2 = arith.constant 0 : index
    %c0_3 = arith.constant 0 : index
    %4 = vector.load %arg3[%c0_2, %c0_3] : memref<256x256xf32, #tpu.memory_space<vmem>>, vector<256x256xf32>
    %cst = arith.constant dense<0.000000e+00> : vector<8x256xf32>
    %5 = tpu.matmul %3, %4, %cst {dimension_numbers = #tpu.dot_dimension_numbers<[1], [0], [0], [1], [0, 0, 1, 1], [], []>} : vector<8x256xf32>, vector<256x256xf32>, vector<8x256xf32> -> vector<8x256xf32>
    %c0_4 = arith.constant 0 : index
    %c0_5 = arith.constant 0 : index
    %6 = vector.load %arg4[%c0_4, %c0_5] : memref<1x256xf32, #tpu.memory_space<vmem>>, vector<1x256xf32>
    %7 = vector.broadcast %6 : vector<1x256xf32> to vector<8x256xf32>
    %8 = arith.addf %5, %7 : vector<8x256xf32>
    %cst_6 = arith.constant 5.000000e-01 : f32
    %9 = vector.broadcast %cst_6 : f32 to vector<8x256xf32>
    %10 = arith.mulf %9, %8 : vector<8x256xf32>
    %cst_7 = arith.constant 0.707106769 : f32
    %11 = vector.broadcast %cst_7 : f32 to vector<8x256xf32>
    %12 = arith.mulf %8, %11 : vector<8x256xf32>
    %13 = math.erf %12 : vector<8x256xf32>
    %cst_8 = arith.constant 1.000000e+00 : f32
    %14 = vector.broadcast %cst_8 : f32 to vector<8x256xf32>
    %15 = arith.addf %14, %13 : vector<8x256xf32>
    %16 = arith.mulf %10, %15 : vector<8x256xf32>
    %c0_9 = arith.constant 0 : index
    %c0_10 = arith.constant 0 : index
    %17 = vector.load %arg8[%c0_9, %c0_10] : memref<8x256xf32, #tpu.memory_space<vmem>>, vector<8x256xf32>
    %c0_11 = arith.constant 0 : index
    %c0_12 = arith.constant 0 : index
    %18 = vector.load %arg5[%c0_11, %c0_12] : memref<256x256xf32, #tpu.memory_space<vmem>>, vector<256x256xf32>
    %cst_13 = arith.constant dense<0.000000e+00> : vector<8x256xf32>
    %19 = tpu.matmul %16, %18, %cst_13 {dimension_numbers = #tpu.dot_dimension_numbers<[1], [0], [0], [1], [0, 0, 1, 1], [], []>} : vector<8x256xf32>, vector<256x256xf32>, vector<8x256xf32> -> vector<8x256xf32>
    %20 = arith.addf %17, %19 : vector<8x256xf32>
    %c0_14 = arith.constant 0 : index
    %c0_15 = arith.constant 0 : index
    %21 = vector.load %arg8[%c0_14, %c0_15] : memref<8x256xf32, #tpu.memory_space<vmem>>, vector<8x256xf32>
    tpu.vector_store %arg8[%c0_14, %c0_15], %20 {strides = array<i32>} : memref<8x256xf32, #tpu.memory_space<vmem>>, vector<8x256xf32>,
    %c0_i32_16 = arith.constant 0 : i32
    %22 = arith.cmpi eq, %arg1, %c0_i32_16 : i32
    %23 = arith.extui %22 : i1 to i32
    %c0_i32_17 = arith.constant 0 : i32
    %24 = arith.cmpi ne, %23, %c0_i32_17 : i32
    scf.if %24 {
      %c0_18 = arith.constant 0 : index
      %c0_19 = arith.constant 0 : index
      %25 = vector.load %arg8[%c0_18, %c0_19] : memref<8x256xf32, #tpu.memory_space<vmem>>, vector<8x256xf32>
      %c0_20 = arith.constant 0 : index
      %c0_21 = arith.constant 0 : index
      %26 = vector.load %arg6[%c0_20, %c0_21] : memref<1x256xf32, #tpu.memory_space<vmem>>, vector<1x256xf32>
      %27 = vector.broadcast %26 : vector<1x256xf32> to vector<8x256xf32>
      %28 = arith.addf %25, %27 : vector<8x256xf32>
      %c0_22 = arith.constant 0 : index
      %c0_23 = arith.constant 0 : index
      %29 = vector.load %arg7[%c0_22, %c0_23] : memref<8x256xf32, #tpu.memory_space<vmem>>, vector<8x256xf32>
      tpu.vector_store %arg7[%c0_22, %c0_23], %28 {strides = array<i32>} : memref<8x256xf32, #tpu.memory_space<vmem>>, vector<8x256xf32>,
    } else {
    }
    return
  }
  func.func @transform_0(%arg0: i32, %arg1: i32) -> (i32, i32) {
    %c0_i32 = arith.constant 0 : i32
    %c0_i32_0 = arith.constant 0 : i32
    return %arg0, %c0_i32 : i32, i32
  }
  func.func @transform_1(%arg0: i32, %arg1: i32) -> (i32, i32) {
    %c0_i32 = arith.constant 0 : i32
    %c0_i32_0 = arith.constant 0 : i32
    return %c0_i32, %arg1 : i32, i32
  }
  func.func @transform_2(%arg0: i32, %arg1: i32) -> (i32, i32) {
    %c0_i32 = arith.constant 0 : i32
    %c0_i32_0 = arith.constant 0 : i32
    return %c0_i32, %arg1 : i32, i32
  }
  func.func @transform_3(%arg0: i32, %arg1: i32) -> (i32, i32) {
    %c0_i32 = arith.constant 0 : i32
    %c0_i32_0 = arith.constant 0 : i32
    return %arg1, %c0_i32 : i32, i32
  }
  func.func @transform_4(%arg0: i32, %arg1: i32) -> (i32, i32) {
    %c0_i32 = arith.constant 0 : i32
    %c0_i32_0 = arith.constant 0 : i32
    %c0_i32_1 = arith.constant 0 : i32
    return %c0_i32, %c0_i32_0 : i32, i32
  }
  func.func @transform_5(%arg0: i32, %arg1: i32) -> (i32, i32) {
    %c0_i32 = arith.constant 0 : i32
    %c0_i32_0 = arith.constant 0 : i32
    return %arg0, %c0_i32 : i32, i32
  }
}

</mosaic_0001>

<bundles_post_ra>
// kernel: tpu_custom_call.1
= control target key start
LH: loop header
LB: loop body
LE: loop exit
PB: predicated region body
PF: predicated region fallthrough
CT: control target
= control target key end

     0   :  { %10 = vsyncpa [#allocation4], 0  ;;  %s1462_s0 = inlined_call_operand.hbm [shape: f32[16,256], index: 0, kind: input, shape index: {}]   ;;  %s1463_s1 = inlined_call_operand.hbm [shape: f32[256,256], index: 1, kind: input, shape index: {}]   ;;  %s1464_s2 = inlined_call_operand.hbm [shape: f32[1,256], index: 2, kind: input, shape index: {}]   ;;  %s1465_s3 = inlined_call_operand.hbm [shape: f32[256,256], index: 3, kind: input, shape index: {}]   ;;  %s1466_s4 = inlined_call_operand.vmem [shape: f32[1,256], index: 4, kind: input, shape index: {}]   ;;  %s1467_s5 = inlined_call_operand.hbm [shape: f32[16,256], index: 5, kind: output, shape index: {}]  }
   0x1   :  { %12 = vsyncpa [#allocation4 + $0x1], 0 }
   0x2   :  { %13 = vsyncpa [#allocation7], 0 }
   0x3   :  { %14 = vsyncpa [#allocation10], 0 }
   0x4   :  { %15 = vsyncpa [#allocation5], 0 }
   0x5   :  { %17 = vsyncpa [#allocation5 + $0x1], 0  ;;  %s1242_s18 = smov 0   ;;  %s1244_s19 = smov 0  }
   0x6   :  { %s1246_s20 = smov 0   ;;  %s1248_s21 = smov 0  }
   0x7   :  { %s1250_s22 = smov 0   ;;  %s1252_s23 = smov 0  }
   0x8 LB: > { %s871_s24 = sadd.s32 4294967295, %s1205_s23   ;;  %p873_p0 = scmp.ge.s32.totalorder %s1205_s23, 1  ;;  %s1205_s23 = sphi %s1252_s23, %s23_s23   ;;  %s1201_s22 = sphi %s1250_s22, %s1479_s22   ;;  %s1197_s21 = sphi %s1248_s21, %s1478_s21   ;;  %s1193_s20 = sphi %s1246_s20, %s1477_s20   ;;  %s1189_s19 = sphi %s1244_s19, %s1476_s19   ;;  %s1185_s18 = sphi %s1242_s18, %s1475_s18  }
   0x9   : > { %p1276_p1 = scmp.eq.s32.totalorder %s871_s24, 0  ;;  %p191_p2 = scmp.lt.s32.totalorder %s1205_s23, 3 }
   0xa   : > { %s205_s28 = sshll.u32 %s1463_s1, 4  ;;  %s1207_s30 = smov [#allocation6]   ;;  %s206_s28 = int_to_ptr.hbm [resolvable:$true] %s205_s28 }
   0xb   : > { %p1284_p3 = pnand %p873_p0, %p191_p2  ;;  %s207_s6 = sshll.u32 %s1207_s30, 4  ;;  %s208_s6 = int_to_ptr.vmem [resolvable:$true] %s207_s6 }
   0xc   : > { %p877_p6 = scmp.ge.s32.totalorder %s1205_s23, 2  ;;  %s222_s10 = sshll.u32 %s1464_s2, 4  ;;  %s223_s10 = int_to_ptr.hbm [resolvable:$true] %s222_s10 }
   0xd   : > { %p912_p4 = pneg %p1284_p3  ;;  %s1208_s11 = smov 256  }
   0xe   : > { %s1209_s12 = smov 16   ;;  %s1210_s13 = smov [#allocation8]  }
   0xf   : > { %p1292_p5 = pnand %p912_p4, %p1276_p1  ;;  %s224_s14 = sshll.u32 %s1210_s13, 4  ;;  %s225_s14 = int_to_ptr.vmem [resolvable:$true] %s224_s14 }
  0x10   : > { %s237_s17 = sshll.u32 %s1465_s3, 4  ;;  %s1211_s26 = smov [#allocation9]   ;;  %s238_s17 = int_to_ptr.hbm [resolvable:$true] %s237_s17 }
  0x11   : > { %915 = dma.hbm_to_vmem [thread:$0]  (!%p1292_p5), %s206_s28, 8192, %s208_s6, [#allocation7], %s1208_s11, %s1208_s11, %s1209_s12  }
  0x12   : > { %918 = dma.hbm_to_vmem [thread:$0]  (!%p1292_p5), %s223_s10, 32, %s225_s14, [#allocation7]  }
  0x13   : > { %s239_s27 = sshll.u32 %s1211_s26, 4  ;;  %s872_s28 = sadd.s32 4294967294, %s1205_s23   ;;  %s240_s27 = int_to_ptr.vmem [resolvable:$true] %s239_s27 }
  0x14   : > { %921 = dma.hbm_to_vmem [thread:$0]  (!%p1292_p5), %s238_s17, 8192, %s240_s27, [#allocation10], %s1208_s11, %s1208_s11, %s1209_s12  }
  0x15   : > { %s35_s30 = sadd.s32 1, %s1201_s22  ;;  %s42_s6 = sadd.s32 1, %s1193_s20 }
  0x16   : > { %p37_p7 = scmp.ge.s32.totalorder %s35_s30, 2  ;;  %p49_p8 = scmp.ne.s32.totalorder %s1193_s20, %s1189_s19 }
  0x17   : > { %p50_p9 = scmp.eq.s32.totalorder %s1205_s23, 0  ;;  %p55_p10 = scmp.ne.s32.totalorder %s1189_s19, %s1185_s18 }
  0x18   : > { %s1481_s30 = smov (%p37_p7, %s35_s30), 0  ;;  %p178_p13 = scmp.eq.s32.totalorder %s871_s24, 1 }
  0x19   : > { %p1319_p11 = por %p50_p9, %p49_p8  ;;  %p1325_p12 = por %p1276_p1, %p55_p10 }
  0x1a   : > { %s39_s9 = ssub.s32 %s1201_s22, %s1481_s30  ;;  %p184_p2 = scmp.eq.s32.totalorder %s872_s28, 1 }
  0x1b   : > { %p40_p0 = scmp.eq.s32.totalorder %s39_s9, 0  ;;  %p1333_p4 = por %p178_p13, %p49_p8 }
  0x1c   : > { %p933_p5 = scmp.lt.s32.totalorder %s1205_s23, 2  ;;  %p1341_p7 = por %p184_p2, %p55_p10 }
  0x1d   : > { %s1339_s11 = scalar_select %p40_p0, %s1193_s20, %s42_s6  }
  0x1e   : > { %s256_s13 = sand.u32 1, %s1193_s20   ;;  %s894_s15 = sshll.u32 %s1201_s22, 4 }
  0x1f   : > { %s878_s14 = sshll.u32 %s256_s13, 4  ;;  %s265_s24 = scalar_lea.hbm %s1462_s0, %s894_s15 }
  0x20   : > { %s260_s26 = scalar_lea.vmem [#allocation3], %s878_s14  ;;  %s267_s28 = sshll.u32 %s265_s24, 4  ;;  %s268_s28 = int_to_ptr.hbm [resolvable:$true] %s267_s28 }
  0x21   : > { %s269_s27 = sshll.u32 %s260_s26, 4  ;;  %p923_p8 = pnand %p933_p5, %p1319_p11  ;;  %s270_s27 = int_to_ptr.vmem [resolvable:$true] %s269_s27 }
  0x22   : > { %s257_s6 = scalar_lea.sflag [#allocation4], %s256_s13  ;;  %278 = sbr.rel (%p1284_p3) target bundleno = 403 (0x193), region = 40 }
  0x23   : > { %925 = dma.hbm_to_vmem [thread:$0]  (!%p923_p8), %s268_s28, 256, %s270_s27, %s257_s6  }
  0x24   : > { %s1355_s9 = sand.u32 (!%p1284_p3), 1, %s1189_s19  }
  0x25   : > { %s882_s15 = sshll.u32 (!%p1284_p3), %s1355_s9, 4  ;;  %s281_s14 = scalar_lea.sflag (!%p1284_p3), [#allocation4], %s1355_s9 }
  0x26   : > { %s1361_s16 = scalar_lea.vmem (!%p1284_p3), [#allocation3], %s882_s15 }
  0x27   : > { %1168 = dma.done.wait (%p1325_p12), %s281_s14, 256  }
  0x28   : > { %1170 = vsyncadd (%p1325_p12), %s281_s14, 4294967040 }
  0x29   : > { %1172 = dma.done.wait (%p1276_p1), [#allocation7], 8224  }
  0x2a   : > { %1174 = vsyncadd (%p1276_p1), [#allocation7], 4294959072 }
  0x2b   : > { %1176 = dma.done.wait (%p1276_p1), [#allocation10], 8192  }
  0x2c   : > { %1178 = vsyncadd (%p1276_p1), [#allocation10], 4294959104  ;;  %v368_v0 = vld [vmem:[#allocation6 + $0xf0] sm:$0xff]  ;;  %v369_v1 = vld [vmem:[#allocation6 + $0xf8] sm:$0xff]  ;;  %s895_s8 = sshll.u32 %s1197_s21, 4  ;;  %s326_s24 = scalar_lea.vmem [#allocation11], %s882_s15 }
  0x2d   : > { %v366_v2 = vld [vmem:[#allocation6 + $0xe0] sm:$0xff]  ;;  %408 = vmatpush.msra.mxu0 %v368_v0  ;;  %448 = vmatpush.msra.mxu2 %v369_v1  ;;  %v400_v3 = vld [vmem:[#allocation6 + $0x1f0] sm:$0xff]  ;;  %v367_v4 = vld [vmem:[#allocation6 + $0xe8] sm:$0xff]  ;;  %s753_s17 = scalar_lea.hbm %s1467_s5, %s895_s8  ;;  %s755_s26 = sshll.u32 %s326_s24, 4  ;;  %s756_s26 = int_to_ptr.vmem [resolvable:$true] %s755_s26 }
  0x2e   : > { %v401_v5 = vld [vmem:[#allocation6 + $0x1f8] sm:$0xff]  ;;  %428 = vmatpush.msra.mxu1 %v400_v3  ;;  %v364_v6 = vld [vmem:[#allocation6 + $0xd0] sm:$0xff]  ;;  %v398_v7 = vld [vmem:[#allocation6 + $0x1e0] sm:$0xff]  ;;  %s757_s27 = sshll.u32 %s753_s17, 4  ;;  %s742_s21 = scalar_lea.sflag [#allocation5], %s1355_s9  ;;  %s758_s27 = int_to_ptr.hbm [resolvable:$true] %s757_s27 }
  0x2f   : > { %468 = vmatpush.msra.mxu3 %v401_v5  ;;  %v365_v8 = vld [vmem:[#allocation6 + $0xd8] sm:$0xff]  ;;  %409 = vmatpush.msra.mxu0 %v366_v2  ;;  %v399_v9 = vld [vmem:[#allocation6 + $0x1e8] sm:$0xff]  ;;  %v396_v10 = vld [vmem:[#allocation6 + $0x1d0] sm:$0xff]  ;;  %s1129_s28 = sshra.s32 %s758_s27, 4  ;;  %s1130_s28 = int_to_ptr.hbm [resolvable:$true] %s1129_s28 }
  0x30   : > { %449 = vmatpush.msra.mxu2 %v367_v4  ;;  %429 = vmatpush.msra.mxu1 %v398_v7  ;;  %v362_v11 = vld [vmem:[#allocation6 + $0xc0] sm:$0xff]  ;;  %v363_v12 = vld [vmem:[#allocation6 + $0xc8] sm:$0xff]  ;;  %v397_v13 = vld [vmem:[#allocation6 + $0x1d8] sm:$0xff]  ;;  %s1131_s6 = scalar_lea.hbm %s1130_s28, 16  ;;  %p1136_p10 = scmp.lt.s32.totalorder %s1130_s28, %s1467_s5 }
  0x31   : > { %469 = vmatpush.msra.mxu3 %v399_v9  ;;  %410 = vmatpush.msra.mxu0 %v364_v6  ;;  %v394_v14 = vld [vmem:[#allocation6 + $0x1c0] sm:$0xff]  ;;  %v395_v15 = vld [vmem:[#allocation6 + $0x1c8] sm:$0xff]  ;;  %v360_v16 = vld [vmem:[#allocation6 + $0xb0] sm:$0xff]  ;;  %p1132_p1 = scmp.ne.s32.totalorder %s1130_s28, %s1131_s6 }
  0x32   : > { %450 = vmatpush.msra.mxu2 %v365_v8  ;;  %430 = vmatpush.msra.mxu1 %v396_v10  ;;  %v361_v17 = vld [vmem:[#allocation6 + $0xb8] sm:$0xff]  ;;  %v392_v18 = vld [vmem:[#allocation6 + $0x1b0] sm:$0xff]  ;;  %v358_v20 = vld [vmem:[#allocation6 + $0xa0] sm:$0xff] }
  0x33   : > { %470 = vmatpush.msra.mxu3 %v397_v13  ;;  %411 = vmatpush.msra.mxu0 %v362_v11  ;;  %v393_v19 = vld [vmem:[#allocation6 + $0x1b8] sm:$0xff]  ;;  %v359_v21 = vld [vmem:[#allocation6 + $0xa8] sm:$0xff]  ;;  %v390_v22 = vld [vmem:[#allocation6 + $0x1a0] sm:$0xff]  ;;  %p1133_p3 = pnand %p1132_p1, %p1333_p4 }
  0x34   : > { %451 = vmatpush.msra.mxu2 %v363_v12  ;;  %431 = vmatpush.msra.mxu1 %v394_v14  ;;  %v391_v23 = vld [vmem:[#allocation6 + $0x1a8] sm:$0xff]  ;;  %v356_v24 = vld [vmem:[#allocation6 + $0x90] sm:$0xff]  ;;  %v357_v25 = vld [vmem:[#allocation6 + $0x98] sm:$0xff] }
  0x35   : > { %471 = vmatpush.msra.mxu3 %v395_v15  ;;  %412 = vmatpush.msra.mxu0 %v360_v16  ;;  %v388_v26 = vld [vmem:[#allocation6 + $0x190] sm:$0xff]  ;;  %v389_v27 = vld [vmem:[#allocation6 + $0x198] sm:$0xff]  ;;  %v354_v28 = vld [vmem:[#allocation6 + $0x80] sm:$0xff]  ;;  %p1134_p9 = pneg %p1133_p3 }
  0x36   : > { %452 = vmatpush.msra.mxu2 %v361_v17  ;;  %432 = vmatpush.msra.mxu1 %v392_v18  ;;  %v355_v29 = vld [vmem:[#allocation6 + $0x88] sm:$0xff]  ;;  %v386_v30 = vld [vmem:[#allocation6 + $0x180] sm:$0xff]  ;;  %v352_v32 = vld [vmem:[#allocation6 + $0x70] sm:$0xff] }
  0x37   : > { %472 = vmatpush.msra.mxu3 %v393_v19  ;;  %413 = vmatpush.msra.mxu0 %v358_v20  ;;  %v387_v31 = vld [vmem:[#allocation6 + $0x188] sm:$0xff]  ;;  %v353_v33 = vld [vmem:[#allocation6 + $0x78] sm:$0xff]  ;;  %v384_v34 = vld [vmem:[#allocation6 + $0x170] sm:$0xff] }
  0x38   : > { %453 = vmatpush.msra.mxu2 %v359_v21  ;;  %433 = vmatpush.msra.mxu1 %v390_v22  ;;  %v385_v35 = vld [vmem:[#allocation6 + $0x178] sm:$0xff]  ;;  %v350_v36 = vld [vmem:[#allocation6 + $0x60] sm:$0xff]  ;;  %v351_v37 = vld [vmem:[#allocation6 + $0x68] sm:$0xff] }
  0x39   : > { %473 = vmatpush.msra.mxu3 %v391_v23  ;;  %414 = vmatpush.msra.mxu0 %v356_v24  ;;  %v382_v38 = vld [vmem:[#allocation6 + $0x160] sm:$0xff]  ;;  %v383_v39 = vld [vmem:[#allocation6 + $0x168] sm:$0xff]  ;;  %v348_v40 = vld [vmem:[#allocation6 + $0x50] sm:$0xff] }
  0x3a   : > { %454 = vmatpush.msra.mxu2 %v357_v25  ;;  %434 = vmatpush.msra.mxu1 %v388_v26  ;;  %v349_v41 = vld [vmem:[#allocation6 + $0x58] sm:$0xff]  ;;  %v380_v42 = vld [vmem:[#allocation6 + $0x150] sm:$0xff]  ;;  %v346_v44 = vld [vmem:[#allocation6 + $0x40] sm:$0xff] }
  0x3b   : > { %474 = vmatpush.msra.mxu3 %v389_v27  ;;  %415 = vmatpush.msra.mxu0 %v354_v28  ;;  %v381_v43 = vld [vmem:[#allocation6 + $0x158] sm:$0xff]  ;;  %v347_v45 = vld [vmem:[#allocation6 + $0x48] sm:$0xff]  ;;  %v378_v46 = vld [vmem:[#allocation6 + $0x140] sm:$0xff] }
  0x3c   : > { %455 = vmatpush.msra.mxu2 %v355_v29  ;;  %435 = vmatpush.msra.mxu1 %v386_v30  ;;  %v379_v47 = vld [vmem:[#allocation6 + $0x148] sm:$0xff]  ;;  %v344_v48 = vld [vmem:[#allocation6 + $0x30] sm:$0xff]  ;;  %v345_v49 = vld [vmem:[#allocation6 + $0x38] sm:$0xff] }
  0x3d   : > { %475 = vmatpush.msra.mxu3 %v387_v31  ;;  %416 = vmatpush.msra.mxu0 %v352_v32  ;;  %v376_v50 = vld [vmem:[#allocation6 + $0x130] sm:$0xff]  ;;  %v377_v51 = vld [vmem:[#allocation6 + $0x138] sm:$0xff]  ;;  %v342_v52 = vld [vmem:[#allocation6 + $0x20] sm:$0xff] }
  0x3e   : > { %456 = vmatpush.msra.mxu2 %v353_v33  ;;  %436 = vmatpush.msra.mxu1 %v384_v34  ;;  %v343_v53 = vld [vmem:[#allocation6 + $0x28] sm:$0xff]  ;;  %v374_v54 = vld [vmem:[#allocation6 + $0x120] sm:$0xff]  ;;  %v340_v56 = vld [vmem:[#allocation6 + $0x10] sm:$0xff] }
  0x3f   : > { %476 = vmatpush.msra.mxu3 %v385_v35  ;;  %417 = vmatpush.msra.mxu0 %v350_v36  ;;  %v375_v55 = vld [vmem:[#allocation6 + $0x128] sm:$0xff]  ;;  %v341_v57 = vld [vmem:[#allocation6 + $0x18] sm:$0xff]  ;;  %v372_v58 = vld [vmem:[#allocation6 + $0x110] sm:$0xff] }
  0x40   : > { %457 = vmatpush.msra.mxu2 %v351_v37  ;;  %437 = vmatpush.msra.mxu1 %v382_v38  ;;  %v373_v59 = vld [vmem:[#allocation6 + $0x118] sm:$0xff]  ;;  %v338_v60 = vld [vmem:[#allocation6] sm:$0xff]  ;;  %v339_v61 = vld [vmem:[#allocation6 + $0x8] sm:$0xff] }
  0x41   : > { %477 = vmatpush.msra.mxu3 %v383_v39  ;;  %418 = vmatpush.msra.mxu0 %v348_v40  ;;  %v336_v62 = vld [vmem:[%s1361_s16] sm:$0xff]  ;;  %v371_v0 = vld [vmem:[#allocation6 + $0x108] sm:$0xff] }
  0x42   : > { %458 = vmatpush.msra.mxu2 %v349_v41  ;;  %438 = vmatpush.msra.mxu1 %v380_v42  ;;  %v370_v63 = vld [vmem:[#allocation6 + $0x100] sm:$0xff]  ;;  %v337_v1 = vld [vmem:[%s1361_s16 + $0x8] sm:$0xff]  ;;  %s1135_s16 = scalar_lea.hbm %s1467_s5, 32 }
  0x43   : > { %478 = vmatpush.msra.mxu3 %v381_v43  ;;  %419 = vmatpush.msra.mxu0 %v346_v44  ;;  %v402_v2 = vld [vmem:[#allocation8] sm:$0x3]  ;;  %v608_v3 = vld [vmem:[#allocation9 + $0xf0] sm:$0xff]  ;;  %v606_v5 = vld [vmem:[#allocation9 + $0xe0] sm:$0xff]  ;;  %p1137_p11 = scmp.lt.s32.totalorder %s1135_s16, %s1131_s6 }
  0x44   : > { %459 = vmatpush.msra.mxu2 %v347_v45  ;;  %439 = vmatpush.msra.mxu1 %v378_v46  ;;  %v609_v4 = vld [vmem:[#allocation9 + $0xf8] sm:$0xff]  ;;  %v607_v6 = vld [vmem:[#allocation9 + $0xe8] sm:$0xff]  ;;  %v404_v7 = vperm.slane %v402_v2, 0  ;;  %v604_v8 = vld [vmem:[#allocation9 + $0xd0] sm:$0xff]  ;;  %v405_v21 = vperm.slane %v402_v2, 1 }
  0x45   : > { %479 = vmatpush.msra.mxu3 %v379_v47  ;;  %420 = vmatpush.msra.mxu0 %v344_v48  ;;  %v605_v9 = vld [vmem:[#allocation9 + $0xd8] sm:$0xff]  ;;  %v602_v11 = vld [vmem:[#allocation9 + $0xc0] sm:$0xff]  ;;  %v640_v12 = vld [vmem:[#allocation9 + $0x1f0] sm:$0xff]  ;;  %p1138_p12 = por %p1137_p11, %p1136_p10 }
  0x46   : > { %460 = vmatpush.msra.mxu2 %v345_v49  ;;  %440 = vmatpush.msra.mxu1 %v376_v50  ;;  %v603_v13 = vld [vmem:[#allocation9 + $0xc8] sm:$0xff]  ;;  %v641_v15 = vld [vmem:[#allocation9 + $0x1f8] sm:$0xff]  ;;  %v600_v17 = vld [vmem:[#allocation9 + $0xb0] sm:$0xff] }
  0x47   : > { %480 = vmatpush.msra.mxu3 %v377_v51  ;;  %421 = vmatpush.msra.mxu0 %v342_v52  ;;  %v638_v18 = vld [vmem:[#allocation9 + $0x1e0] sm:$0xff]  ;;  %v601_v19 = vld [vmem:[#allocation9 + $0xb8] sm:$0xff]  ;;  %v639_v22 = vld [vmem:[#allocation9 + $0x1e8] sm:$0xff]  ;;  %p1139_p13 = pnand %p1138_p12, %p1134_p9 }
  0x48   : > { %461 = vmatpush.msra.mxu2 %v343_v53  ;;  %441 = vmatpush.msra.mxu1 %v374_v54  ;;  %v598_v23 = vld [vmem:[#allocation9 + $0xa0] sm:$0xff]  ;;  %v636_v24 = vld [vmem:[#allocation9 + $0x1d0] sm:$0xff]  ;;  %v599_v25 = vld [vmem:[#allocation9 + $0xa8] sm:$0xff] }
  0x49   : > { %481 = vmatpush.msra.mxu3 %v375_v55  ;;  %422 = vmatpush.msra.mxu0 %v340_v56  ;;  %v637_v27 = vld [vmem:[#allocation9 + $0x1d8] sm:$0xff]  ;;  %v596_v29 = vld [vmem:[#allocation9 + $0x90] sm:$0xff]  ;;  %v634_v30 = vld [vmem:[#allocation9 + $0x1c0] sm:$0xff] }
  0x4a   : > { %462 = vmatpush.msra.mxu2 %v341_v57  ;;  %442 = vmatpush.msra.mxu1 %v372_v58  ;;  %v597_v31 = vld [vmem:[#allocation9 + $0x98] sm:$0xff]  ;;  %v635_v34 = vld [vmem:[#allocation9 + $0x1c8] sm:$0xff]  ;;  %v594_v36 = vld [vmem:[#allocation9 + $0x80] sm:$0xff] }
  0x4b   : > { %482 = vmatpush.msra.mxu3 %v373_v59  ;;  %423 = vmatpush.msra.mxu0 %v338_v60  ;;  %v632_v37 = vld [vmem:[#allocation9 + $0x1b0] sm:$0xff]  ;;  %v595_v38 = vld [vmem:[#allocation9 + $0x88] sm:$0xff]  ;;  %v633_v41 = vld [vmem:[#allocation9 + $0x1b8] sm:$0xff] }
  0x4c   : > { %463 = vmatpush.msra.mxu2 %v339_v61  ;;  %424 = vmatmul.f32.vlgmr.msra.gmra.mxu0 %v336_v62  ;;  %v592_v42 = vld [vmem:[#allocation9 + $0x70] sm:$0xff]  ;;  %v630_v43 = vld [vmem:[#allocation9 + $0x1a0] sm:$0xff]  ;;  %v593_v44 = vld [vmem:[#allocation9 + $0x78] sm:$0xff] }
  0x4d   : > { %464 = vmatmul.f32.vlgmr.msra.gmra.mxu2 %v336_v62  ;;  %443 = vmatpush.msra.mxu1 %v370_v63  ;;  %v631_v47 = vld [vmem:[#allocation9 + $0x1a8] sm:$0xff]  ;;  %v590_v49 = vld [vmem:[#allocation9 + $0x60] sm:$0xff]  ;;  %v628_v50 = vld [vmem:[#allocation9 + $0x190] sm:$0xff] }
  0x4e   : > { %483 = vmatpush.msra.mxu3 %v371_v0  ;;  %444 = vmatmul.f32.vlgmr.msra.gmra.mxu1 %v337_v1  ;;  %v591_v51 = vld [vmem:[#allocation9 + $0x68] sm:$0xff]  ;;  %v629_v54 = vld [vmem:[#allocation9 + $0x198] sm:$0xff]  ;;  %v588_v56 = vld [vmem:[#allocation9 + $0x50] sm:$0xff] }
  0x4f   : > { %484 = vmatmul.f32.vlgmr.msra.gmra.mxu3 %v337_v1  ;;  %642 = vmatpush.msrb.mxu0 %v608_v3  ;;  %v626_v57 = vld [vmem:[#allocation9 + $0x180] sm:$0xff]  ;;  %v589_v58 = vld [vmem:[#allocation9 + $0x58] sm:$0xff]  ;;  %v627_v61 = vld [vmem:[#allocation9 + $0x188] sm:$0xff] }
  0x50   : > { %682 = vmatpush.msrb.mxu2 %v609_v4  ;;  %662 = vmatpush.msrb.mxu1 %v640_v12  ;;  %v586_v63 = vld [vmem:[#allocation9 + $0x40] sm:$0xff]  ;;  %v624_v0 = vld [vmem:[#allocation9 + $0x170] sm:$0xff]  ;;  %v587_v1 = vld [vmem:[#allocation9 + $0x48] sm:$0xff] }
  0x51   : > { %643 = vmatpush.msrb.mxu0 %v606_v5  ;;  %702 = vmatpush.msrb.mxu3 %v641_v15  ;;  %v625_v4 = vld [vmem:[#allocation9 + $0x178] sm:$0xff]  ;;  %v620_v15 = vld [vmem:[#allocation9 + $0x150] sm:$0xff] }
  0x52   : > { %683 = vmatpush.msrb.mxu2 %v607_v6  ;;  %663 = vmatpush.msrb.mxu1 %v638_v18  ;;  %v621_v18 = vld [vmem:[#allocation9 + $0x158] sm:$0xff] }
  0x53   : > { %644 = vmatpush.msrb.mxu0 %v604_v8  ;;  %703 = vmatpush.msrb.mxu3 %v639_v22  ;;  %v622_v8 = vld [vmem:[#allocation9 + $0x160] sm:$0xff] }
  0x54   : > { %684 = vmatpush.msrb.mxu2 %v605_v9  ;;  %664 = vmatpush.msrb.mxu1 %v636_v24  ;;  %v618_v24 = vld [vmem:[#allocation9 + $0x140] sm:$0xff] }
  0x55   : > { %645 = vmatpush.msrb.mxu0 %v602_v11  ;;  %704 = vmatpush.msrb.mxu3 %v637_v27  ;;  %v623_v11 = vld [vmem:[#allocation9 + $0x168] sm:$0xff] }
  0x56   : > { %685 = vmatpush.msrb.mxu2 %v603_v13  ;;  %665 = vmatpush.msrb.mxu1 %v634_v30  ;;  %v616_v30 = vld [vmem:[#allocation9 + $0x130] sm:$0xff] }
  0x57   : > { %646 = vmatpush.msrb.mxu0 %v600_v17  ;;  %705 = vmatpush.msrb.mxu3 %v635_v34  ;;  %v583_v17 = vld [vmem:[#allocation9 + $0x28] sm:$0xff] }
  0x58   : > { %686 = vmatpush.msrb.mxu2 %v601_v19  ;;  %666 = vmatpush.msrb.mxu1 %v632_v37  ;;  %v615_v37 = vld [vmem:[#allocation9 + $0x128] sm:$0xff] }
  0x59   : > { %647 = vmatpush.msrb.mxu0 %v598_v23  ;;  %706 = vmatpush.msrb.mxu3 %v633_v41  ;;  %v580_v23 = vld [vmem:[#allocation9 + $0x10] sm:$0xff] }
  0x5a   : > { %687 = vmatpush.msrb.mxu2 %v599_v25  ;;  %667 = vmatpush.msrb.mxu1 %v630_v43  ;;  %v581_v25 = vld [vmem:[#allocation9 + $0x18] sm:$0xff] }
  0x5b   : > { %648 = vmatpush.msrb.mxu0 %v596_v29  ;;  %707 = vmatpush.msrb.mxu3 %v631_v47  ;;  %v578_v29 = vld [vmem:[#allocation9] sm:$0xff] }
  0x5c   : > { %688 = vmatpush.msrb.mxu2 %v597_v31  ;;  %668 = vmatpush.msrb.mxu1 %v628_v50  ;;  %v611_v50 = vld [vmem:[#allocation9 + $0x108] sm:$0xff] }
  0x5d   : > { %649 = vmatpush.msrb.mxu0 %v594_v36  ;;  %708 = vmatpush.msrb.mxu3 %v629_v54  ;;  %v614_v36 = vld [vmem:[#allocation9 + $0x120] sm:$0xff] }
  0x5e   : > { %689 = vmatpush.msrb.mxu2 %v595_v38  ;;  %669 = vmatpush.msrb.mxu1 %v626_v57 }
  0x5f   : > { %650 = vmatpush.msrb.mxu0 %v592_v42  ;;  %709 = vmatpush.msrb.mxu3 %v627_v61  ;;  %v612_v42 = vld [vmem:[#allocation9 + $0x110] sm:$0xff] }
  0x60   : > { %690 = vmatpush.msrb.mxu2 %v593_v44  ;;  %670 = vmatpush.msrb.mxu1 %v624_v0  ;;  %v613_v44 = vld [vmem:[#allocation9 + $0x118] sm:$0xff] }
  0x61   : > { %651 = vmatpush.msrb.mxu0 %v590_v49  ;;  %710 = vmatpush.msrb.mxu3 %v625_v4 }
  0x62   : > { %691 = vmatpush.msrb.mxu2 %v591_v51  ;;  %671 = vmatpush.msrb.mxu1 %v622_v8 }
  0x63   : > { %652 = vmatpush.msrb.mxu0 %v588_v56  ;;  %711 = vmatpush.msrb.mxu3 %v623_v11 }
  0x64   : > { %692 = vmatpush.msrb.mxu2 %v589_v58  ;;  %672 = vmatpush.msrb.mxu1 %v620_v15 }
  0x65   : > { %653 = vmatpush.msrb.mxu0 %v586_v63  ;;  %712 = vmatpush.msrb.mxu3 %v621_v18 }
  0x66   : > { %693 = vmatpush.msrb.mxu2 %v587_v1  ;;  %673 = vmatpush.msrb.mxu1 %v618_v24 }
  0x68   : > { %674 = vmatpush.msrb.mxu1 %v616_v30 }
  0x6a   : > { %675 = vmatpush.msrb.mxu1 %v614_v36 }
  0x6c   : > { %676 = vmatpush.msrb.mxu1 %v612_v42 }
  0xc9   : > { %v425_v10 = vpop.f32.mrf.mxu0 }
  0xca   : > { %v426_v14 = vadd.f32 %v425_v10, %v404_v7  ;;  %v584_v7 = vld [vmem:[#allocation9 + $0x30] sm:$0xff]  ;;  %v585_v10 = vld [vmem:[#allocation9 + $0x38] sm:$0xff] }
  0xcb   : > { %v445_v16 = vpop.f32.mrf.mxu1  ;;  %654 = vmatpush.msrb.mxu0 %v584_v7  ;;  %694 = vmatpush.msrb.mxu2 %v585_v10 }
  0xcc   : > { %v1377_v20 = vadd.f32 %v445_v16, %v426_v14  ;;  %v582_v14 = vld [vmem:[#allocation9 + $0x20] sm:$0xff] }
  0xcd   : > { %655 = vmatpush.msrb.mxu0 %v582_v14  ;;  %695 = vmatpush.msrb.mxu2 %v583_v17 }
  0xce   : > { %v1380_v26 = vmul.f32 0.70710677, %v1377_v20 }
  0xcf   : > { %656 = vmatpush.msrb.mxu0 %v580_v23  ;;  %696 = vmatpush.msrb.mxu2 %v581_v25 }
  0xd0   : > { %v465_v28 = vpop.f32.mrf.mxu2  ;;  %v492_v32 = vmul.f32 %v1380_v26, %v1380_v26 }
  0xd1   : > { %v466_v33 = vadd.f32 %v465_v28, %v405_v21  ;;  %v619_v28 = vld [vmem:[#allocation9 + $0x148] sm:$0xff]  ;;  %657 = vmatpush.msrb.mxu0 %v578_v29 }
  0xd2   : > { %v485_v35 = vpop.f32.mrf.mxu3  ;;  %v1384_v39 = vmin.f32 %v492_v32, 16.0  ;;  %713 = vmatpush.msrb.mxu3 %v619_v28  ;;  %v579_v32 = vld [vmem:[#allocation9 + $0x8] sm:$0xff] }
  0xd3   : > { %v1386_v40 = vadd.f32 %v485_v35, %v466_v33  ;;  %v617_v33 = vld [vmem:[#allocation9 + $0x138] sm:$0xff]  ;;  %697 = vmatpush.msrb.mxu2 %v579_v32 }
  0xd4   : > { %v494_v45 = vmul.f32 2.1237322e-06, %v1384_v39  ;;  %v505_v46 = vmul.f32 3.8918573e-05, %v1384_v39  ;;  %714 = vmatpush.msrb.mxu3 %v617_v33 }
  0xd5   : > { %v1391_v48 = vmul.f32 0.70710677, %v1386_v40  ;;  %v489_v29 = vmul.f32 0.5, %v1386_v40 }
  0xd6   : > { %v495_v52 = vadd.f32 0.00028619796, %v494_v45  ;;  %v506_v53 = vadd.f32 0.001143296, %v505_v46  ;;  %715 = vmatpush.msrb.mxu3 %v615_v37  ;;  %v610_v46 = vld [vmem:[#allocation9 + $0x100] sm:$0xff] }
  0xd7   : > { %v532_v55 = vmul.f32 %v1391_v48, %v1391_v48  ;;  %677 = vmatpush.msrb.mxu1 %v610_v46 }
  0xd8   : > { %v496_v59 = vmul.f32 %v495_v52, %v1384_v39  ;;  %v507_v60 = vmul.f32 %v506_v53, %v1384_v39  ;;  %716 = vmatpush.msrb.mxu3 %v613_v44 }
  0xd9   : > { %v1397_v62 = vmin.f32 %v532_v55, 16.0 }
  0xda   : > { %v497_v2 = vadd.f32 0.0036580483, %v496_v59  ;;  %v508_v3 = vadd.f32 0.014752088, %v507_v60  ;;  %717 = vmatpush.msrb.mxu3 %v611_v50 }
  0xdb   : > { %v534_v5 = vmul.f32 2.1237322e-06, %v1397_v62  ;;  %v545_v6 = vmul.f32 3.8918573e-05, %v1397_v62 }
  0xdc   : > { %v509_v9 = vmul.f32 %v508_v3, %v1384_v39  ;;  %v498_v19 = vmul.f32 %v497_v2, %v1384_v39 }
  0xdd   : > { %v535_v12 = vadd.f32 0.00028619796, %v534_v5  ;;  %v546_v13 = vadd.f32 0.001143296, %v545_v6 }
  0xde   : > { %v510_v16 = vadd.f32 0.112945676, %v509_v9  ;;  %v499_v38 = vadd.f32 0.05243302, %v498_v19 }
  0xdf   : > { %v536_v21 = vmul.f32 %v535_v12, %v1397_v62  ;;  %v547_v22 = vmul.f32 %v546_v13, %v1397_v62 }
  0xe0   : > { %v511_v27 = vmul.f32 %v510_v16, %v1384_v39  ;;  %v500_v51 = vmul.f32 %v499_v38, %v1384_v39 }
  0xe1   : > { %v548_v31 = vadd.f32 0.014752088, %v547_v22  ;;  %v537_v35 = vadd.f32 0.0036580483, %v536_v21  ;;  %v488_v21 = vmul.f32 0.5, %v1377_v20 }
  0xe2   : > { %v512_v34 = vadd.f32 0.4994258, %v511_v27  ;;  %v501_v55 = vadd.f32 0.18741608, %v500_v51  ;;  %v731_v20 = vld [vmem:[%s1466_s4] sm:$0x3] }
  0xe3   : > { %v549_v41 = vmul.f32 %v548_v31, %v1397_v62  ;;  %v538_v49 = vmul.f32 %v537_v35, %v1397_v62  ;;  %v734_v40 = vperm.slane %v731_v20, 1 }
  0xe4   : > { %v513_v43 = vmul.f32 %v512_v34, %v1384_v39  ;;  %v502_v60 = vmul.f32 %v501_v55, %v1384_v39 }
  0xe5   : > { %v550_v45 = vadd.f32 0.112945676, %v549_v41  ;;  %v539_v54 = vadd.f32 0.05243302, %v538_v49 }
  0xe6   : > { %v514_v47 = vadd.f32 1.0, %v513_v43  ;;  %v503_v2 = vadd.f32 1.1283791, %v502_v60 }
  0xe7   : > { %v551_v52 = vmul.f32 %v550_v45, %v1397_v62  ;;  %v540_v59 = vmul.f32 %v539_v54, %v1397_v62 }
  0xe8   : > { %991 = vrcp.f32 %v514_v47  ;;  %v526_v0 = vand.u32 2147483648, %v514_v47  ;;  %v524_v4 = vand.u32 2147483647, %v514_v47  ;;  %vm520_vm1 = vweird.f32 %v514_v47 }
  0xe9   : > { %v552_v53 = vadd.f32 0.4994258, %v551_v52  ;;  %v541_v1 = vadd.f32 0.18741608, %v540_v59  ;;  %v504_v10 = vmul.f32 %v503_v2, %v1380_v26 }
  0xea   : > { %v527_v7 = vor.u32 1.1754944e-38, %v526_v0  ;;  %vm525_vm3 = vcmp.eq.f32.partialorder %v524_v4, 8.507059e+37 }
  0xeb   : > { %v553_v56 = vmul.f32 %v552_v53, %v1397_v62  ;;  %v542_v8 = vmul.f32 %v541_v1, %v1397_v62 }
  0xed   : > { %v554_v57 = vadd.f32 1.0, %v553_v56  ;;  %v543_v15 = vadd.f32 1.1283791, %v542_v8 }
  0xee   : > { %v992_v58 = vpop.eup %991 }
  0xef   : > { %v516_v61 = vmul.f32 %v992_v58, %v514_v47  ;;  %993 = vrcp.f32 %v554_v57  ;;  %vm521_vm0 = vweird.f32 %v992_v58  ;;  %v566_v14 = vand.u32 2147483648, %v554_v57 }
  0xf0   : > { %vm522_vm2 = vmor %vm520_vm1, %vm521_vm0  ;;  %v564_v17 = vand.u32 2147483647, %v554_v57  ;;  %vm560_vm5 = vweird.f32 %v554_v57  ;;  %v544_v26 = vmul.f32 %v543_v15, %v1391_v48  ;;  %v733_v48 = vperm.slane %v731_v20, 0 }
  0xf1   : > { %v517_v63 = vsub.f32 1.0, %v516_v61  ;;  %v567_v62 = vor.u32 1.1754944e-38, %v566_v14 }
  0xf2   : > { %vm565_vm7 = vcmp.eq.f32.partialorder %v564_v17, 8.507059e+37 }
  0xf3   : > { %v518_v3 = vmul.f32 %v992_v58, %v517_v63 }
  0xf5   : > { %v994_v5 = vpop.eup %993  ;;  %v519_v6 = vadd.f32 %v992_v58, %v518_v3 }
  0xf6   : > { %v556_v9 = vmul.f32 %v994_v5, %v554_v57  ;;  %vm561_vm4 = vweird.f32 %v994_v5 }
  0xf7   : > { %v523_v39 = vsel %vm522_vm2, %v992_v58, %v519_v6  ;;  %vm562_vm6 = vmor %vm560_vm5, %vm561_vm4 }
  0xf8   : > { %v528_v11 = vsel %vm525_vm3, %v527_v7, %v523_v39  ;;  %v557_v12 = vsub.f32 1.0, %v556_v9 }
  0xf9   : > { %v529_v13 = vmul.f32 %v528_v11, %v504_v10 }
  0xfa   : > { %v558_v16 = vmul.f32 %v994_v5, %v557_v12 }
  0xfb   : > { %v887_v18 = vclamps-f32 %v529_v13, 1.0 }
  0xfc   : > { %v559_v19 = vadd.f32 %v994_v5, %v558_v16 }
  0xfd   : > { %v572_v22 = vadd.f32 1.0, %v887_v18 }
  0xfe   : > { %v563_v23 = vsel %vm562_vm6, %v994_v5, %v559_v19 }
  0xff   : > { %v568_v24 = vsel %vm565_vm7, %v567_v62, %v563_v23  ;;  %v574_v25 = vmul.f32 %v572_v22, %v488_v21 }
 0x100   : > { %v569_v27 = vmul.f32 %v568_v24, %v544_v26 }
 0x101   : > { %658 = vmatmul.f32.vlgmr.msrb.gmra.mxu0 %v574_v25  ;;  %698 = vmatmul.f32.vlgmr.msrb.gmra.mxu2 %v574_v25 }
 0x102   : > { %v888_v28 = vclamps-f32 %v569_v27, 1.0 }
 0x104   : > { %v573_v30 = vadd.f32 1.0, %v888_v28 }
 0x106   : > { %v575_v31 = vmul.f32 %v573_v30, %v489_v29 }
 0x108   : > { %678 = vmatmul.f32.vlgmr.msrb.gmra.mxu1 %v575_v31  ;;  %718 = vmatmul.f32.vlgmr.msrb.gmra.mxu3 %v575_v31 }
 0x17e   : > { %v659_v32 = vpop.f32.mrf.mxu0 }
 0x184   : > { %v699_v36 = vpop.f32.mrf.mxu2 }
 0x185   : > { %v679_v33 = vpop.f32.mrf.mxu1 }
 0x186   : > { %v680_v34 = vadd.f32 %v679_v33, %v659_v32 }
 0x188   : > { %v737_v35 = vadd.f32 %v733_v48, %v680_v34 }
 0x18a   : > { %739 = vst [vmem:[%s326_s24] sm:$0xff] %v737_v35 }
 0x18b   : > { %v719_v37 = vpop.f32.mrf.mxu3 }
 0x18c   : > { %v720_v38 = vadd.f32 %v719_v37, %v699_v36 }
 0x18e   : > { %v738_v41 = vadd.f32 %v734_v40, %v720_v38 }
 0x190   : > { %740 = vst [vmem:[%s326_s24 + $0x8] sm:$0xff] %v738_v41 }
 0x191   : > { %1142 = shalt.err (!%p1139_p13)
}
 0x192   : > { %910 = dma.vmem_to_hbm [thread:$0]  (%p1333_p4), %s756_s26, 256, %s758_s27, %s742_s21  }
 0x193 PF: > { %s769_s9 = sand.u32 1, %s1185_s18   ;;  %p927_p0 = pnand %p877_p6, %p1341_p7 }
 0x194   : > { %s770_s8 = scalar_lea.sflag [#allocation5], %s769_s9 }
 0x195   : > { %p928_p2 = pneg %p927_p0 }
 0x197   : > { %1180 = dma.done.wait (%p928_p2), %s770_s8, 256  }
 0x198   : > { %1182 = vsyncadd (%p928_p2), %s770_s8, 4294967040  ;;  %s23_s23 = sadd.s32 1, %s1205_s23   ;;  %s1475_s18 = smov %s1189_s19 }
 0x199   : > { %p20_p5 = scmp.ge.s32.totalorder %s23_s23, 4   ;;  %s1476_s19 = smov %s1193_s20 }
 0x19a   : > { %s1477_s20 = smov %s1339_s11  ;;  %s1478_s21 = smov %s1201_s22 }
 0x19b   : > { %s1479_s22 = smov %s1481_s30  ;;  %22 = sbr.rel (!%p20_p5) target bundleno = 8 (0x8), region = 108 }
 0x1a0   :  { %776 = vsyncpa [#allocation4], 1 }
 0x1a1   :  { %778 = vsyncpa [#allocation4 + $0x1], 1 }
 0x1a2   :  { %779 = vsyncpa [#allocation7], 1 }
 0x1a3   :  { %780 = vsyncpa [#allocation10], 1 }
 0x1a4   :  { %781 = vsyncpa [#allocation5], 1 }
 0x1a5   :  { %783 = vsyncpa [#allocation5 + $0x1], 1 }

</bundles_post_ra>
